<compile_context>
chip_gen: v6e
topology: v6e:2x2x1
jax: 0.10.0
libtpu: 0.0.40
codegen_flags: <defaults>
</compile_context>

<pallas_src>
import functools

import jax
import jax.numpy as jnp
import numpy as np
from jax import lax
from jax.experimental import pallas as pl
from jax.experimental.pallas import tpu as pltpu

EPS = 1e-6
_VMEM_LIMIT_BYTES = 48 * 1024 * 1024   # < 64 MiB physical on v7x; plenty on v5e/v6e


def _pow(base, gamma):
    gf = float(gamma)
    if gf.is_integer():
        # matches torch.pow for integral float exponents (incl. tiny negative bases)
        return lax.integer_pow(base, int(gf))
    return jnp.power(base, gf)


def _class_weights(counts, weight_type):
    """counts: (C, 1) f32 -> class weights (C, 1) f32."""
    if weight_type == "balanced":
        return 1.0 / (counts + EPS)
    # inverse_frequency
    total = jnp.sum(counts, axis=0, keepdims=True)
    return total / (counts + EPS)


def _focal_tile(x_ref, t_ref, cw, loss_ref, *, alpha, gamma, num_classes, fast_log):
    """Per-sample focal loss for one (TB, C) logits tile.

    The tile is loaded straight from the (N, C) HBM layout (no wrapper
    transpose), upcast, and transposed in-VMEM so all elementwise exp/log/pow
    work runs lane-dense on the sample axis; the per-sample output is a
    lane-dense (1, TB) row (plain unmasked stores).
    """
    x = x_ref[...].astype(jnp.float32).T          # (C, TB)  XLU transpose
    t = t_ref[...]                                # (1, TB) int32
    tb = x.shape[1]

    # numerically stable softmax over the class (sublane) axis, + eps
    m = jnp.max(x, axis=0, keepdims=True)         # (1, TB)
    e = jnp.exp(x - m)                            # (C, TB)
    denom = jnp.sum(e, axis=0, keepdims=True)     # (1, TB)
    inv = pl.reciprocal(denom, approx=False)      # per-sample only; ~2 ulp
    p = e * inv + EPS                             # (C, TB)

    if fast_log:
        # Opt-in EUP relief (v7x): one log per sample instead of C.
        # Slight deviation from the reference (drops the +EPS inside the log).
        logp = (x - m) - jnp.log(denom)           # (C, TB)
    else:
        logp = jnp.log(p)                         # (C, TB)

    # one_hot(target) + eps (kornia one_hot adds eps everywhere)
    ids = lax.broadcasted_iota(jnp.int32, (num_classes, tb), 0)
    oh = jnp.where(ids == t, 1.0, 0.0) + EPS      # (C, TB)

    w = _pow(1.0 - p, gamma)                      # (1 - p)^gamma
    focal = (-alpha) * cw * w * logp              # (C, TB)
    loss_ref[...] = jnp.sum(oh * focal, axis=0, keepdims=True)   # (1, TB)


# ----------------------------- fused single pass -----------------------------

def _fused_kernel(x_ref, t_ref, t_full_ref, loss_ref, cw_ref, *,
                  alpha, gamma, num_classes, weight_type, fast_log):
    """Bincount + class weights at step 0 (resident full targets), focal per step."""
    @pl.when(pl.program_id(0) == 0)
    def _():
        tf = t_full_ref[...]                                        # (1, N) exact
        ids = lax.broadcasted_iota(jnp.int32, (num_classes, tf.shape[-1]), 0)
        counts = jnp.sum(jnp.where(ids == tf, 1.0, 0.0),
                         axis=1, keepdims=True)                     # (C, 1)
        cw_ref[...] = _class_weights(counts, weight_type)

    _focal_tile(x_ref, t_ref, cw_ref[...], loss_ref, alpha=alpha, gamma=gamma,
                num_classes=num_classes, fast_log=fast_log)


# ------------------------------ two-pass (big N) -----------------------------

def _bincount_kernel(t_ref, cnt_ref, *, num_classes, n_total):
    """Tiled class bincount with a resident (C, 1) accumulator."""
    i = pl.program_id(0)
    tb = t_ref.shape[-1]
    t = t_ref[...]                                                  # (1, TB)

    # Mask the ragged tail (garbage lanes of a partial boundary block).
    lane = lax.broadcasted_iota(jnp.int32, (1, tb), 1)
    valid = (i * tb + lane) < n_total
    tv = jnp.where(valid, t, -1)                                    # -1 = no class

    ids = lax.broadcasted_iota(jnp.int32, (num_classes, tb), 0)
    partial = jnp.sum(jnp.where(ids == tv, 1.0, 0.0),
                      axis=1, keepdims=True)                        # (C, 1)

    @pl.when(i == 0)
    def _():
        cnt_ref[...] = jnp.zeros_like(cnt_ref)

    cnt_ref[...] += partial


def _focal_kernel(x_ref, t_ref, cnt_ref, loss_ref, *, alpha, gamma,
                  num_classes, weight_type, fast_log):
    cw = _class_weights(cnt_ref[...], weight_type)                  # (C, 1)
    _focal_tile(x_ref, t_ref, cw, loss_ref, alpha=alpha, gamma=gamma,
                num_classes=num_classes, fast_log=fast_log)


# ---------------------------------- wrapper ----------------------------------

def _round_block(n, requested):
    """Full array if it fits, else the largest lane-aligned block <= requested."""
    if n <= requested:
        return n
    return max(128, (requested // 128) * 128)


def weighted_adaptive_focal_loss(logits, target, *, alpha, gamma=2.0,
                                 reduction="none", weight_type="balanced",
                                 adaptive_gamma=False, block_n=8192,
                                 bincount_block=65536, fuse_threshold=65536,
                                 fast_log=False):
    if adaptive_gamma:
        # TODO(synk): adaptive_gamma has no general equivalent (see header).
        raise NotImplementedError("adaptive_gamma=True is not supported")
    if weight_type not in ("balanced", "inverse_frequency"):
        raise ValueError(f"Unknown weight type: {weight_type}")

    n, c = logits.shape
    assert target.shape == (n,), "target must be (N,)"

    # Logits go in untouched (native (N, C) layout and dtype): no wrapper-side
    # transpose/upcast => no extra HBM round trip. Upcast + transpose happen
    # per tile inside the kernel.
    t2 = target.astype(jnp.int32).reshape(1, n)

    common = dict(alpha=float(alpha), gamma=float(gamma), num_classes=c,
                  weight_type=weight_type, fast_log=fast_log)

    # Fused path when the full targets + step-0 one-hot comfortably fit VMEM.
    fuse = (n <= fuse_threshold) and (n * c * 4 <= 8 * 1024 * 1024)

    if fuse:
        blk = _round_block(n, block_n)
        loss2d = pl.pallas_call(
            functools.partial(_fused_kernel, **common),
            grid=(pl.cdiv(n, blk),),
            in_specs=[
                pl.BlockSpec((blk, c), lambda i: (i, 0)),    # logits tile (untransposed)
                pl.BlockSpec((1, blk), lambda i: (0, i)),    # targets tile
                pl.BlockSpec((1, n), lambda i: (0, 0)),      # full targets, resident
            ],
            out_specs=pl.BlockSpec((1, blk), lambda i: (0, i)),
            out_shape=jax.ShapeDtypeStruct((1, n), jnp.float32),
            scratch_shapes=[pltpu.VMEM((c, 1), jnp.float32)],   # class weights
            # 'arbitrary': the step-0-initialized class-weight scratch must be
            # visible to every grid step (no cross-core grid split on v7x).
            compiler_params=pltpu.CompilerParams(
                dimension_semantics=("arbitrary",),
                vmem_limit_bytes=_VMEM_LIMIT_BYTES),
        )(logits, t2, t2)
    else:
        # ---- Pass 1: class bincount (4 B/sample), big blocks => overhead-free
        blk1 = _round_block(n, bincount_block)
        counts = pl.pallas_call(
            functools.partial(_bincount_kernel, num_classes=c, n_total=n),
            grid=(pl.cdiv(n, blk1),),
            in_specs=[pl.BlockSpec((1, blk1), lambda i: (0, i))],
            out_specs=pl.BlockSpec((c, 1), lambda i: (0, 0)),    # resident accumulator
            out_shape=jax.ShapeDtypeStruct((c, 1), jnp.float32),
            compiler_params=pltpu.CompilerParams(
                dimension_semantics=("arbitrary",),
                vmem_limit_bytes=_VMEM_LIMIT_BYTES),
        )(t2)

        # ---- Pass 2: per-sample focal loss; keep >= 4 grid steps (v7x megacore)
        blk2 = min(_round_block(n, block_n), max(128, 128 * pl.cdiv(n, 4 * 128)))
        loss2d = pl.pallas_call(
            functools.partial(_focal_kernel, **common),
            grid=(pl.cdiv(n, blk2),),
            in_specs=[
                pl.BlockSpec((blk2, c), lambda i: (i, 0)),
                pl.BlockSpec((1, blk2), lambda i: (0, i)),
                pl.BlockSpec((c, 1), lambda i: (0, 0)),
            ],
            out_specs=pl.BlockSpec((1, blk2), lambda i: (0, i)),
            out_shape=jax.ShapeDtypeStruct((1, n), jnp.float32),
            compiler_params=pltpu.CompilerParams(
                dimension_semantics=("parallel",),
                vmem_limit_bytes=_VMEM_LIMIT_BYTES),
        )(logits, t2, counts)

    loss = loss2d[0]
    if reduction == "none":
        return loss
    elif reduction == "mean":
        return jnp.mean(loss)
    elif reduction == "sum":
        return jnp.sum(loss)
    raise NotImplementedError(f"Invalid reduction mode: {reduction}")


def _reference_loss(logits, target, *, alpha, gamma, weight_type="balanced"):
    """Pure-JAX transliteration of the PyTorch forward (reduction='none')."""
    c = logits.shape[1]
    p = jax.nn.softmax(logits.astype(jnp.float32), axis=1) + EPS
    oh = jax.nn.one_hot(target, c, dtype=jnp.float32) + EPS
    counts = jnp.zeros((c,), jnp.float32).at[target].add(1.0)
    if weight_type == "balanced":
        cw = 1.0 / (counts + EPS)
    else:
        cw = counts.sum() / (counts + EPS)
    w = (1.0 - p) ** gamma
    focal = -alpha * cw * w * jnp.log(p)
    return jnp.sum(oh * focal, axis=1)


if __name__ == "__main__":
    ALPHA, GAMMA = 0.25, 2.0
    key = jax.random.PRNGKey(0)
    k1, k2, k3, k4 = jax.random.split(key, 4)

    # Case 1: fused path, multiple grid steps (blk=128 -> grid=2) so the
    # step-0 class-weight scratch is reused at step 1. weight_type='balanced'.
    n1, c1 = 256, 16
    logits1 = jax.random.normal(k1, (n1, c1), dtype=jnp.float32) * 3.0
    target1 = jax.random.randint(k2, (n1,), 0, c1, dtype=jnp.int32)

    out1 = jax.block_until_ready(weighted_adaptive_focal_loss(
        logits1, target1, alpha=ALPHA, gamma=GAMMA,
        reduction="none", weight_type="balanced", block_n=128))
    ref1 = _reference_loss(logits1, target1, alpha=ALPHA, gamma=GAMMA)
    np.testing.assert_allclose(np.asarray(out1), np.asarray(ref1),
                               rtol=1e-5, atol=1e-6)

    out1m = jax.block_until_ready(weighted_adaptive_focal_loss(
        logits1, target1, alpha=ALPHA, gamma=GAMMA, reduction="mean"))
    np.testing.assert_allclose(np.asarray(out1m), np.asarray(ref1.mean()),
                               rtol=1e-5, atol=1e-6)

    # Case 2: ragged N, fused single-block path, 'inverse_frequency'.
    n2, c2 = 200, 16
    logits2 = jax.random.normal(k3, (n2, c2), dtype=jnp.float32)
    target2 = jax.random.randint(k4, (n2,), 0, c2, dtype=jnp.int32)

    out2 = jax.block_until_ready(weighted_adaptive_focal_loss(
        logits2, target2, alpha=ALPHA, gamma=GAMMA,
        reduction="none", weight_type="inverse_frequency"))
    ref2 = _reference_loss(logits2, target2, alpha=ALPHA, gamma=GAMMA,
                           weight_type="inverse_frequency")
    np.testing.assert_allclose(np.asarray(out2), np.asarray(ref2),
                               rtol=1e-5, atol=1e-6)

    # Case 3: force the two-pass (large-N) path with ragged partial blocks in
    # both the bincount pass and the focal pass.
    out3 = jax.block_until_ready(weighted_adaptive_focal_loss(
        logits2, target2, alpha=ALPHA, gamma=GAMMA,
        reduction="none", weight_type="balanced",
        fuse_threshold=0, block_n=128, bincount_block=128))
    ref3 = _reference_loss(logits2, target2, alpha=ALPHA, gamma=GAMMA,
                           weight_type="balanced")
    np.testing.assert_allclose(np.asarray(out3), np.asarray(ref3),
                               rtol=1e-5, atol=1e-6)

    print("KERNEL_OK")
</pallas_src>

<mosaic_0001>
module attributes {stable_mosaic.version = 11 : i64} {
  func.func @_fused_kernel(%arg0: i32, %arg1: memref<128x16xf32, #tpu.memory_space<vmem>>, %arg2: memref<1x128xi32, #tpu.memory_space<vmem>>, %arg3: memref<1x256xi32, #tpu.memory_space<vmem>>, %arg4: memref<1x128xf32, #tpu.memory_space<vmem>>, %arg5: memref<16x1xf32, #tpu.memory_space<vmem>>) attributes {dimension_semantics = [#tpu.dimension_semantics<arbitrary>], iteration_bounds = array<i64: 2>, scalar_prefetch = 0 : i64, scratch_operands = 1 : i64, tpu.core_type = #tpu.core_type<tc>, window_params = [{transform_indices = @transform_0, window_bounds = array<i64: 128, 16>}, {transform_indices = @transform_1, window_bounds = array<i64: 1, 128>}, {pipeline_mode = #tpu.pipeline_mode<synchronous>, transform_indices = @transform_2, window_bounds = array<i64: 1, 256>}, {transform_indices = @transform_3, window_bounds = array<i64: 1, 128>}]} {
    %c0_i32 = arith.constant 0 : i32
    %0 = arith.cmpi eq, %arg0, %c0_i32 : i32
    %1 = arith.extui %0 : i1 to i32
    %c0_i32_0 = arith.constant 0 : i32
    %2 = arith.cmpi ne, %1, %c0_i32_0 : i32
    scf.if %2 {
      %c0_16 = arith.constant 0 : index
      %c0_17 = arith.constant 0 : index
      %40 = vector.load %arg3[%c0_16, %c0_17] : memref<1x256xi32, #tpu.memory_space<vmem>>, vector<1x256xi32>
      %41 = tpu.iota {dimensions = array<i32: 0>} : vector<16x256xi32>
      %42 = vector.broadcast %40 : vector<1x256xi32> to vector<16x256xi32>
      %43 = arith.cmpi eq, %41, %42 : vector<16x256xi32>
      %cst_18 = arith.constant 1.000000e+00 : f32
      %cst_19 = arith.constant 0.000000e+00 : f32
      %44 = vector.broadcast %cst_18 : f32 to vector<16x256xf32>
      %45 = vector.broadcast %cst_19 : f32 to vector<16x256xf32>
      %46 = arith.select %43, %44, %45 : vector<16x256xi1>, vector<16x256xf32>
      %cst_20 = arith.constant dense<0.000000e+00> : vector<16xf32>
      %47 = vector.multi_reduction <add>, %46, %cst_20 [1] : vector<16x256xf32> to vector<16xf32>
      %48 = vector.shape_cast %47 : vector<16xf32> to vector<16x1xf32>
      %cst_21 = arith.constant 9.99999997E-7 : f32
      %49 = vector.broadcast %cst_21 : f32 to vector<16x1xf32>
      %50 = arith.addf %48, %49 : vector<16x1xf32>
      %cst_22 = arith.constant 1.000000e+00 : f32
      %51 = vector.broadcast %cst_22 : f32 to vector<16x1xf32>
      %52 = arith.divf %51, %50 : vector<16x1xf32>
      %c0_23 = arith.constant 0 : index
      %c0_24 = arith.constant 0 : index
      %53 = vector.load %arg5[%c0_23, %c0_24] : memref<16x1xf32, #tpu.memory_space<vmem>>, vector<16x1xf32>
      tpu.vector_store %arg5[%c0_23, %c0_24], %52 {strides = array<i32>} : memref<16x1xf32, #tpu.memory_space<vmem>>, vector<16x1xf32>,
    } else {
    }
    %c0 = arith.constant 0 : index
    %c0_1 = arith.constant 0 : index
    %3 = vector.load %arg5[%c0, %c0_1] : memref<16x1xf32, #tpu.memory_space<vmem>>, vector<16x1xf32>
    %c0_2 = arith.constant 0 : index
    %c0_3 = arith.constant 0 : index
    %4 = vector.load %arg1[%c0_2, %c0_3] : memref<128x16xf32, #tpu.memory_space<vmem>>, vector<128x16xf32>
    %5 = tpu.transpose %4, [1, 0] : vector<128x16xf32> -> vector<16x128xf32>
    %c0_4 = arith.constant 0 : index
    %c0_5 = arith.constant 0 : index
    %6 = vector.load %arg2[%c0_4, %c0_5] : memref<1x128xi32, #tpu.memory_space<vmem>>, vector<1x128xi32>
    %cst = arith.constant dense<0xFF800000> : vector<128xf32>
    %7 = vector.multi_reduction <maximumf>, %5, %cst [0] : vector<16x128xf32> to vector<128xf32>
    %8 = vector.shape_cast %7 : vector<128xf32> to vector<1x128xf32>
    %9 = vector.broadcast %8 : vector<1x128xf32> to vector<16x128xf32>
    %10 = arith.subf %5, %9 : vector<16x128xf32>
    %11 = math.exp %10 : vector<16x128xf32>
    %cst_6 = arith.constant dense<0.000000e+00> : vector<128xf32>
    %12 = vector.multi_reduction <add>, %11, %cst_6 [0] : vector<16x128xf32> to vector<128xf32>
    %13 = vector.shape_cast %12 : vector<128xf32> to vector<1x128xf32>
    %14 = tpu.reciprocal %13 : vector<1x128xf32> -> vector<1x128xf32>
    %15 = vector.broadcast %14 : vector<1x128xf32> to vector<16x128xf32>
    %16 = arith.mulf %11, %15 : vector<16x128xf32>
    %cst_7 = arith.constant 9.99999997E-7 : f32
    %17 = vector.broadcast %cst_7 : f32 to vector<16x128xf32>
    %18 = arith.addf %16, %17 : vector<16x128xf32>
    %19 = math.log %18 : vector<16x128xf32>
    %20 = tpu.iota {dimensions = array<i32: 0>} : vector<16x128xi32>
    %21 = vector.broadcast %6 : vector<1x128xi32> to vector<16x128xi32>
    %22 = arith.cmpi eq, %20, %21 : vector<16x128xi32>
    %cst_8 = arith.constant 1.000000e+00 : f32
    %cst_9 = arith.constant 0.000000e+00 : f32
    %23 = vector.broadcast %cst_8 : f32 to vector<16x128xf32>
    %24 = vector.broadcast %cst_9 : f32 to vector<16x128xf32>
    %25 = arith.select %22, %23, %24 : vector<16x128xi1>, vector<16x128xf32>
    %cst_10 = arith.constant 9.99999997E-7 : f32
    %26 = vector.broadcast %cst_10 : f32 to vector<16x128xf32>
    %27 = arith.addf %25, %26 : vector<16x128xf32>
    %cst_11 = arith.constant 1.000000e+00 : f32
    %28 = vector.broadcast %cst_11 : f32 to vector<16x128xf32>
    %29 = arith.subf %28, %18 : vector<16x128xf32>
    %30 = arith.mulf %29, %29 : vector<16x128xf32>
    %cst_12 = arith.constant -2.500000e-01 : f32
    %31 = vector.broadcast %cst_12 : f32 to vector<16x1xf32>
    %32 = arith.mulf %31, %3 : vector<16x1xf32>
    %33 = vector.broadcast %32 : vector<16x1xf32> to vector<16x128xf32>
    %34 = arith.mulf %33, %30 : vector<16x128xf32>
    %35 = arith.mulf %34, %19 : vector<16x128xf32>
    %36 = arith.mulf %27, %35 : vector<16x128xf32>
    %cst_13 = arith.constant dense<0.000000e+00> : vector<128xf32>
    %37 = vector.multi_reduction <add>, %36, %cst_13 [0] : vector<16x128xf32> to vector<128xf32>
    %38 = vector.shape_cast %37 : vector<128xf32> to vector<1x128xf32>
    %c0_14 = arith.constant 0 : index
    %c0_15 = arith.constant 0 : index
    %39 = vector.load %arg4[%c0_14, %c0_15] : memref<1x128xf32, #tpu.memory_space<vmem>>, vector<1x128xf32>
    tpu.vector_store %arg4[%c0_14, %c0_15], %38 {strides = array<i32>} : memref<1x128xf32, #tpu.memory_space<vmem>>, vector<1x128xf32>,
    return
  }
  func.func @transform_0(%arg0: i32) -> (i32, i32) {
    %c0_i32 = arith.constant 0 : i32
    %c0_i32_0 = arith.constant 0 : i32
    return %arg0, %c0_i32 : i32, i32
  }
  func.func @transform_1(%arg0: i32) -> (i32, i32) {
    %c0_i32 = arith.constant 0 : i32
    %c0_i32_0 = arith.constant 0 : i32
    return %c0_i32, %arg0 : i32, i32
  }
  func.func @transform_2(%arg0: i32) -> (i32, i32) {
    %c0_i32 = arith.constant 0 : i32
    %c0_i32_0 = arith.constant 0 : i32
    %c0_i32_1 = arith.constant 0 : i32
    return %c0_i32, %c0_i32_0 : i32, i32
  }
  func.func @transform_3(%arg0: i32) -> (i32, i32) {
    %c0_i32 = arith.constant 0 : i32
    %c0_i32_0 = arith.constant 0 : i32
    return %c0_i32, %arg0 : i32, i32
  }
}

</mosaic_0001>

<bundles_post_ra>
// kernel: tpu_custom_call.1
= control target key start
LH: loop header
LB: loop body
LE: loop exit
PB: predicated region body
PF: predicated region fallthrough
CT: control target
= control target key end

     0   :  { %8 = vsyncpa [#allocation4], 0  ;;  %s704_s0 = inlined_call_operand.vmem [shape: f32[256,16], index: 0, kind: input, shape index: {}]   ;;  %s705_s1 = inlined_call_operand.vmem [shape: s32[1,256], index: 1, kind: input, shape index: {}]   ;;  %s706_s2 = inlined_call_operand.vmem [shape: s32[1,256], index: 2, kind: input, shape index: {}]   ;;  %s707_s3 = inlined_call_operand.hbm [shape: f32[1,256], index: 3, kind: output, shape index: {}]  }
   0x1   :  { %10 = vsyncpa [#allocation4 + $0x1], 0  ;;  %s578_s12 = smov 0   ;;  %s580_s13 = smov 0  }
   0x2   :  { %s582_s14 = smov 0   ;;  %s584_s15 = smov 0  }
   0x3 LB: > { %s422_s16 = sadd.s32 4294967295, %s552_s15   ;;  %s423_s17 = sadd.s32 4294967294, %s552_s15   ;;  %s552_s15 = sphi %s584_s15, %s713_s15   ;;  %s548_s14 = sphi %s582_s14, %s712_s14   ;;  %s544_s13 = sphi %s580_s13, %s711_s13   ;;  %s540_s12 = sphi %s578_s12, %s710_s12  }
   0x4   : > { %s601_s18 = sadd.s32 1, %s552_s15   ;;  %s96_s19 = sadd.s32 1, %s548_s14 }
   0x5   : > { %s93_s20 = ssub.s32 %s552_s15, %s601_s18  ;;  %p106_p0 = scmp.ne.s32.totalorder %s548_s14, %s544_s13 }
   0x6   : > { %p94_p1 = scmp.eq.s32.totalorder %s93_s20, 0  ;;  %p107_p2 = scmp.eq.s32.totalorder %s422_s16, 1 }
   0x7   : > { %p112_p3 = scmp.ne.s32.totalorder %s544_s13, %s540_s12  ;;  %p113_p4 = scmp.eq.s32.totalorder %s423_s17, 1 }
   0x8   : > { %s611_s21 = scalar_select %p94_p1, %s548_s14, %s96_s19  }
   0x9   : > { %p613_p5 = por %p107_p2, %p106_p0  ;;  %p617_p6 = por %p113_p4, %p112_p3 }
   0xa   : > { %p426_p7 = scmp.ge.s32.totalorder %s552_s15, 1  ;;  %p149_p8 = scmp.lt.s32.totalorder %s552_s15, 3 }
   0xc   : > { %p150_p9 = pnand %p426_p7, %p149_p8 }
   0xd   : > { %s173_s24 = sand.u32 (!%p150_p9), 1, %s544_s13   ;;  %s624_s25 = sshll.u32 (!%p150_p9), %s422_s16, 4 }
   0xe   : > { %153 = sbr.rel (%p150_p9) target bundleno = 440 (0x1b8), region = 32  ;;  %p176_p10 = scmp.lt.s32.totalorder (!%p150_p9), %s624_s25, 31 }
   0xf   : > { %p181_p11 = scmp.lt.s32.totalorder (!%p150_p9), %s422_s16, 1  ;;  %s641_s8 = scalar_lea.vmem (!%p150_p9), [#allocation3], %s173_s24 }
  0x10   : > { %p429_p12 = scmp.ne.s32.totalorder (!%p150_p9), %s422_s16, 0 }
  0x13   : > { %s177_s26 = scalar_select %p176_p10, %s624_s25, 31 }
  0x14   : > { %s628_s27 = scalar_select %p181_p11, %s422_s16, 1 }
  0x15   : > { %s428_s28 = sshll.u32 %s177_s26, 3  ;;  %187 = sbr.rel (%p429_p12) target bundleno = 197 (0xc5), region = 36 }
  0x16   : > { %s633_s4 = scalar_lea.vmem %s704_s0, %s428_s28  ;;  %s183_s7 = scalar_lea.vmem %s705_s1, %s628_s27 }
  0x1a   : > { %v189_v0 = vlaneseq  ;;  %v188_v2 = vld [vmem:[%s706_s2] sm:$0x3]  ;;  %v554_v8 = vmov 0.0   ;;  %vm220_vm4 = vcmask 7168  }
  0x1c   : > { %v190_v1 = vshrl.u32 %v189_v0, 7 }
  0x1e   : > { %v194_v3 = vsub.s32 0, %v190_v1  ;;  %v198_v4 = vsub.s32 1, %v190_v1  ;;  %v191_v5 = vadd.s32 8, %v190_v1 }
  0x20   : > { %v195_v6 = vrot.slane %v188_v2, %v194_v3  ;;  %v199_v7 = vrot.slane %v188_v2, %v198_v4 }
  0x22   : > { %vm200_vm0 = vcmp.eq.s32.totalorder %v190_v1, %v195_v6  ;;  %vm201_vm1 = vcmp.eq.s32.totalorder %v190_v1, %v199_v7  ;;  %vm202_vm2 = vcmp.eq.s32.totalorder %v191_v5, %v195_v6  ;;  %vm203_vm3 = vcmp.eq.s32.totalorder %v191_v5, %v199_v7 }
  0x23   : > { %v204_v9 = vsel %vm200_vm0, 1.0, %v554_v8  ;;  %v205_v10 = vsel %vm201_vm1, 1.0, %v554_v8  ;;  %v206_v11 = vsel %vm202_vm2, 1.0, %v554_v8  ;;  %v207_v12 = vsel %vm203_vm3, 1.0, %v554_v8 }
  0x24   : > { %v208_v13 = vadd.f32 %v205_v10, %v204_v9  ;;  %v211_v14 = vadd.f32 %v207_v12, %v206_v11 }
  0x26   : > { %209 = vadd.xlane.f32.xlu0 %v208_v13 }
  0x2a   : > { %212 = vadd.xlane.f32.xlu0 %v211_v14 }
  0xaf   : > { %v210_v15 = vpop.xlane.xlu0 %209 }
  0xb0   : > { %v214_v16 = vadd.f32 1e-06, %v210_v15 }
  0xb2   : > { %476 = vrcp.f32 %v214_v16 }
  0xb3   : > { %v213_v17 = vpop.xlane.xlu0 %212 }
  0xb4   : > { %v215_v18 = vadd.f32 1e-06, %v213_v17 }
  0xb6   : > { %478 = vrcp.f32 %v215_v18 }
  0xbf   : > { %v477_v19 = vpop.eup %476 }
  0xc0   : > { %221 = vst.msk [vmem:[#allocation2] sm:$0xff] %vm220_vm4, %v477_v19 }
  0xc3   : > { %v479_v20 = vpop.eup %478 }
  0xc4   : > { %222 = vst.msk [vmem:[#allocation2 + $0x8] sm:$0xff] %vm220_vm4, %v479_v20 }
  0xc5 PF: > { %v225_v21 = vld [vmem:[%s633_s4] sm:$0xff]  ;;  %v555_v22 = vmov 0   ;;  %v226_v23 = vld [vmem:[%s633_s4 + $0x8] sm:$0xff]  ;;  %v227_v26 = vld [vmem:[%s633_s4 + $0x10] sm:$0xff]  ;;  %v303_v3 = vlaneseq  ;;  %v556_v13 = vmov 0.0   ;;  %s359_s17 = sshll.u32 %s641_s8, 4  ;;  %s357_s26 = scalar_lea.hbm %s707_s3, %s624_s25  ;;  %s360_s17 = int_to_ptr.vmem [resolvable:$true] %s359_s17 }
  0xc6   : > { %241 = vxpose.xlu0.b32.start [1/16] (narrow) %v225_v21, 16  ;;  %480 = vset.pattern.permute.xlu1 %v555_v22  ;;  %v228_v29 = vld [vmem:[%s633_s4 + $0x18] sm:$0xff]  ;;  %v229_v30 = vld [vmem:[%s633_s4 + $0x20] sm:$0xff]  ;;  %v230_v31 = vld [vmem:[%s633_s4 + $0x28] sm:$0xff]  ;;  %s347_s27 = scalar_lea.sflag [#allocation4], %s173_s24  ;;  %s492_s28 = scalar_lea.vmem %s360_s17, 16 }
  0xc7   : > { %v223_v24 = vld [vmem:[#allocation2] sm:$0xff]  ;;  %v231_v32 = vld [vmem:[%s633_s4 + $0x30] sm:$0xff]  ;;  %v232_v33 = vld [vmem:[%s633_s4 + $0x38] sm:$0xff]  ;;  %v304_v6 = vshrl.u32 %v303_v3, 7  ;;  %p493_p13 = scmp.ne.s32.totalorder %s360_s17, %s492_s28  ;;  %s557_s29 = smov [#allocation3]  }
  0xc8   : > { %v320_v27 = vmul.f32 -0.25, %v223_v24  ;;  %v233_v34 = vld [vmem:[%s633_s4 + $0x40] sm:$0xff]  ;;  %v234_v35 = vld [vmem:[%s633_s4 + $0x48] sm:$0xff]  ;;  %v235_v36 = vld [vmem:[%s633_s4 + $0x50] sm:$0xff]  ;;  %s496_s30 = sshll.u32 %s557_s29, 4  ;;  %s497_s30 = int_to_ptr.vmem [resolvable:$false] %s496_s30 }
  0xc9   : > { %v236_v37 = vld [vmem:[%s633_s4 + $0x58] sm:$0xff]  ;;  %v237_v38 = vld [vmem:[%s633_s4 + $0x60] sm:$0xff]  ;;  %v238_v39 = vld [vmem:[%s633_s4 + $0x68] sm:$0xff]  ;;  %v305_v8 = vadd.s32 8, %v304_v6  ;;  %p494_p0 = pnand %p493_p13, %p613_p5  ;;  %p499_p2 = scmp.lt.s32.totalorder %s360_s17, %s497_s30 }
  0xca   : > { %242 = vxpose.xlu0.b32.cont [2/16] (narrow) %v226_v23, 16  ;;  %324 = vperm.xlu1 %480, %v320_v27   ;;  %v239_v40 = vld [vmem:[%s633_s4 + $0x70] sm:$0xff]  ;;  %v240_v41 = vld [vmem:[%s633_s4 + $0x78] sm:$0xff]  ;;  %v430_v7 = vld [vmem:[%s183_s7] ss:$0 sm:$0xff]  ;;  %s498_s4 = scalar_lea.vmem %s497_s30, 32 }
  0xcb   : > { %v224_v25 = vld [vmem:[#allocation2 + $0x8] sm:$0xff]  ;;  %vm310_vm5 = vcmp.eq.s32.totalorder %v304_v6, %v430_v7  ;;  %vm311_vm6 = vcmp.eq.s32.totalorder %v305_v8, %v430_v7  ;;  %p495_p1 = pneg %p494_p0  ;;  %p500_p3 = scmp.lt.s32.totalorder %s498_s4, %s492_s28 }
  0xcc   : > { %v321_v28 = vmul.f32 -0.25, %v224_v25  ;;  %v312_v14 = vsel %vm310_vm5, 1.0, %v556_v13  ;;  %v313_v16 = vsel %vm311_vm6, 1.0, %v556_v13 }
  0xcd   : > { %v314_v21 = vadd.f32 1e-06, %v312_v14  ;;  %v315_v24 = vadd.f32 1e-06, %v313_v16  ;;  %p501_p4 = por %p500_p3, %p499_p2 }
  0xce   : > { %243 = vxpose.xlu0.b32.cont [3/16] (narrow) %v227_v26, 16  ;;  %329 = vperm.xlu1 %480, %v321_v28  }
  0xcf   : > { %p502_p7 = pnand %p501_p4, %p495_p1 }
  0xd2   : > { %244 = vxpose.xlu0.b32.cont [4/16] (narrow) %v228_v29, 16 }
  0xd6   : > { %245 = vxpose.xlu0.b32.cont [5/16] (narrow) %v229_v30, 16 }
  0xda   : > { %246 = vxpose.xlu0.b32.cont [6/16] (narrow) %v230_v31, 16 }
  0xde   : > { %247 = vxpose.xlu0.b32.cont [7/16] (narrow) %v231_v32, 16 }
  0xe2   : > { %248 = vxpose.xlu0.b32.cont [8/16] (narrow) %v232_v33, 16 }
  0xe6   : > { %249 = vxpose.xlu0.b32.cont [9/16] (narrow) %v233_v34, 16 }
  0xea   : > { %250 = vxpose.xlu0.b32.cont [10/16] (narrow) %v234_v35, 16 }
  0xee   : > { %251 = vxpose.xlu0.b32.cont [11/16] (narrow) %v235_v36, 16 }
  0xf2   : > { %252 = vxpose.xlu0.b32.cont [12/16] (narrow) %v236_v37, 16 }
  0xf6   : > { %253 = vxpose.xlu0.b32.cont [13/16] (narrow) %v237_v38, 16 }
  0xfa   : > { %254 = vxpose.xlu0.b32.cont [14/16] (narrow) %v238_v39, 16 }
  0xfe   : > { %255 = vxpose.xlu0.b32.cont [15/16] (narrow) %v239_v40, 16 }
 0x102   : > { %256 = vxpose.xlu0.b32.end [16/16] (narrow) %v240_v41, 16 }
 0x12b   : > { %481 = vset.pattern.permute.xlu0 %v555_v22 }
 0x142   : > { %v257_v42 = vpop.trf.xlu0 }
 0x145   : > { %v325_v10 = vpop.permute.xlu1 %324 }
 0x146   : > { %v258_v43 = vpop.trf.xlu0 }
 0x147   : > { %v274_v44 = vmax.f32 %v257_v42, %v258_v43 }
 0x149   : > { %v275_v45 = vrot.slane %v274_v44, 4  ;;  %v330_v17 = vpop.permute.xlu1 %329 }
 0x14b   : > { %v276_v46 = vmax.f32 %v274_v44, %v275_v45 }
 0x14d   : > { %v277_v47 = vrot.slane %v276_v46, 2 }
 0x14f   : > { %v278_v48 = vmax.f32 %v276_v46, %v277_v47 }
 0x151   : > { %v279_v49 = vrot.slane %v278_v48, 1 }
 0x153   : > { %v280_v50 = vmax.f32 %v278_v48, %v279_v49 }
 0x155   : > { %v281_v51 = vsub.f32 %v257_v42, %v280_v50  ;;  %v282_v52 = vsub.f32 %v258_v43, %v280_v50 }
 0x157   : > { %v283_v53 = vmul.f32 1.442695, %v281_v51  ;;  %v285_v54 = vmul.f32 1.442695, %v282_v52 }
 0x159   : > { %482 = vpow2.f32 %v283_v53 }
 0x15a   : > { %484 = vpow2.f32 %v285_v54 }
 0x166   : > { %v483_v55 = vpop.eup %482 }
 0x167   : > { %v485_v56 = vpop.eup %484 }
 0x168   : > { %v287_v57 = vadd.f32 %v485_v56, %v483_v55 }
 0x16a   : > { %v288_v58 = vrot.slane %v287_v57, 4 }
 0x16c   : > { %v289_v59 = vadd.f32 %v288_v58, %v287_v57 }
 0x16e   : > { %v290_v60 = vrot.slane %v289_v59, 2 }
 0x170   : > { %v291_v61 = vadd.f32 %v290_v60, %v289_v59 }
 0x172   : > { %v292_v62 = vrot.slane %v291_v61, 1 }
 0x174   : > { %v293_v63 = vadd.f32 %v292_v62, %v291_v61 }
 0x176   : > { %486 = vrcp.f32 %v293_v63 }
 0x183   : > { %v487_v0 = vpop.eup %486 }
 0x184   : > { %v295_v1 = vmul.f32 %v487_v0, %v483_v55  ;;  %v296_v2 = vmul.f32 %v487_v0, %v485_v56 }
 0x186   : > { %v297_v4 = vadd.f32 1e-06, %v295_v1  ;;  %v298_v5 = vadd.f32 1e-06, %v296_v2 }
 0x188   : > { %488 = vlog2.f32 %v297_v4  ;;  %v316_v9 = vsub.f32 1.0, %v297_v4  ;;  %v317_v11 = vsub.f32 1.0, %v298_v5 }
 0x189   : > { %490 = vlog2.f32 %v298_v5 }
 0x18a   : > { %v318_v12 = vmul.f32 %v316_v9, %v316_v9  ;;  %v319_v15 = vmul.f32 %v317_v11, %v317_v11 }
 0x18c   : > { %v332_v22 = vmul.f32 %v325_v10, %v318_v12  ;;  %v333_v25 = vmul.f32 %v330_v17, %v319_v15 }
 0x195   : > { %v489_v18 = vpop.eup %488 }
 0x196   : > { %v491_v19 = vpop.eup %490  ;;  %v300_v20 = vmul.f32 0.6931472, %v489_v18 }
 0x197   : > { %v302_v23 = vmul.f32 0.6931472, %v491_v19 }
 0x198   : > { %v334_v26 = vmul.f32 %v332_v22, %v300_v20 }
 0x199   : > { %v335_v27 = vmul.f32 %v333_v25, %v302_v23 }
 0x19a   : > { %v336_v28 = vmul.f32 %v334_v26, %v314_v21 }
 0x19b   : > { %v337_v29 = vmul.f32 %v335_v27, %v315_v24 }
 0x19d   : > { %v338_v30 = vadd.f32 %v337_v29, %v336_v28 }
 0x19f   : > { %v339_v31 = vrot.slane %v338_v30, 4 }
 0x1a1   : > { %v340_v32 = vadd.f32 %v339_v31, %v338_v30 }
 0x1a3   : > { %v341_v33 = vrot.slane %v340_v32, 2 }
 0x1a5   : > { %v342_v34 = vadd.f32 %v341_v33, %v340_v32 }
 0x1a7   : > { %v343_v35 = vrot.slane %v342_v34, 1 }
 0x1a9   : > { %v344_v36 = vadd.f32 %v343_v35, %v342_v34 }
 0x1ab   : > { %345 = vst [vmem:[%s641_s8] sm:$0x1] %v344_v36 }
 0x1ac   : > { %505 = shalt.err (!%p502_p7)
}
 0x1ad   : > { %s506_s5 = scalar_lea.hbm %s357_s26, 16  ;;  %s510_s6 = scalar_lea.hbm %s707_s3, 32 }
 0x1ae   : > { %p507_p8 = scmp.ne.s32.totalorder %s357_s26, %s506_s5  ;;  %p511_p11 = scmp.lt.s32.totalorder %s357_s26, %s707_s3 }
 0x1af   : > { %p512_p12 = scmp.lt.s32.totalorder %s510_s6, %s506_s5 }
 0x1b0   : > { %p508_p9 = pnand %p507_p8, %p613_p5 }
 0x1b1   : > { %p513_p13 = por %p512_p12, %p511_p11 }
 0x1b2   : > { %p509_p10 = pneg %p508_p9 }
 0x1b4   : > { %p514_p0 = pnand %p513_p13, %p509_p10 }
 0x1b6   : > { %517 = shalt.err (!%p514_p0)
}
 0x1b7   : > { %434 = dma.vmem_to_hbm [thread:$0]  (%p613_p5), %s360_s17, 16, %s357_s26, %s347_s27  }
 0x1b8 PF: > { %p440_p1 = scmp.ge.s32.totalorder %s552_s15, 2  ;;  %s371_s9 = sand.u32 1, %s540_s12  }
 0x1b9   : > { %s372_s10 = scalar_lea.sflag [#allocation4], %s371_s9 }
 0x1ba   : > { %p437_p2 = pnand %p440_p1, %p617_p6 }
 0x1bc   : > { %p438_p3 = pneg %p437_p2 }
 0x1be   : > { %535 = dma.done.wait (%p438_p3), %s372_s10, 16  }
 0x1bf   : > { %537 = vsyncadd (%p438_p3), %s372_s10, 4294967280  ;;  %p13_p4 = scmp.ge.s32.totalorder %s601_s18, 4   ;;  %s710_s12 = smov %s544_s13 }
 0x1c0   : > { %s711_s13 = smov %s548_s14  ;;  %s712_s14 = smov %s611_s21 }
 0x1c1   : > { %s713_s15 = smov %s601_s18  ;;  %15 = sbr.rel (!%p13_p4) target bundleno = 3 (0x3), region = 74 }
 0x1c6   :  { %376 = vsyncpa [#allocation4], 1 }
 0x1c7   :  { %378 = vsyncpa [#allocation4 + $0x1], 1 }

</bundles_post_ra>
